<compile_context>
chip_gen: v7x
topology: tpu7x:2x2x1
jax: 0.10.0
libtpu: 0.0.40
codegen_flags: <defaults>
</compile_context>

<pallas_src>
import functools

import jax
import jax.numpy as jnp
from jax.experimental import pallas as pl
from jax.experimental.pallas import tpu as pltpu


def _round_up(x, m):
    return ((x + m - 1) // m) * m


def _darec_loss_kernel(src_pred_ref, src_rat_ref,
                       tgt_pred_ref, tgt_rat_ref,
                       logits_ref, labels_ref,
                       partial_ref, src_mask_ref, tgt_mask_ref,
                       *, beta, u,
                       tile_src, tile_tgt, n_src, n_tgt,
                       blocks_src, blocks_tgt,
                       need_valid_src, need_valid_tgt):
    k = pl.program_id(0)

    def tile_loss(pred_ref, rat_ref, mask_ref, tile, n_valid, nblk, need_valid):
        rat = rat_ref[...].astype(jnp.float32)
        pred = pred_ref[...].astype(jnp.float32)
        mask = rat != 0.0
        mask_ref[...] = mask.astype(jnp.int8)
        diff = jnp.where(mask, pred, 0.0) - rat
        d2 = diff * diff
        if not need_valid:
            # No ragged tail and no clamped steps for this side (static): plain sum.
            return jnp.sum(d2)

        def tail():
            # Lane-validity kills ragged-tail padding and clamped duplicate steps.
            lane = jax.lax.broadcasted_iota(jnp.int32, d2.shape, 1)
            valid = (k * tile + lane) < n_valid
            return jnp.sum(jnp.where(valid, d2, 0.0))

        def interior():
            return jnp.sum(d2)

        # Only the last real block (and any clamped steps beyond it) needs masking.
        return jax.lax.cond(k >= nblk - 1, tail, interior)

    src_part = tile_loss(src_pred_ref, src_rat_ref, src_mask_ref,
                         tile_src, n_src, blocks_src, need_valid_src)
    tgt_part = tile_loss(tgt_pred_ref, tgt_rat_ref, tgt_mask_ref,
                         tile_tgt, n_tgt, blocks_tgt, need_valid_tgt)
    total = src_part + beta * tgt_part

    # ---- domain-classifier cross entropy (mean over batch), only at k == 0 ----
    def ce_fn():
        logits = logits_ref[...].astype(jnp.float32)           # (B, C)
        labels = labels_ref[...]                                # (B, 1) int32
        bsz, ncls = logits.shape
        m = jnp.max(logits, axis=-1, keepdims=True)
        lse = jnp.log(jnp.sum(jnp.exp(logits - m), axis=-1, keepdims=True)) + m
        col = jax.lax.broadcasted_iota(jnp.int32, (bsz, ncls), 1)
        picked = jnp.sum(jnp.where(col == labels, logits, 0.0),
                         axis=-1, keepdims=True)
        return jnp.sum(lse - picked) * jnp.float32(u / bsz)

    total = total + jax.lax.cond(k == 0, ce_fn, lambda: jnp.float32(0.0))

    # Per-tile partial loss written into this step's own (8,128) block (lane 0, row 0).
    row = jax.lax.broadcasted_iota(jnp.int32, (8, 128), 0)
    lane = jax.lax.broadcasted_iota(jnp.int32, (8, 128), 1)
    partial_ref[...] = jnp.where((row == 0) & (lane == 0), total, jnp.float32(0.0))


def darec_loss(class_output, source_prediction, target_prediction,
               source_rating, target_rating, labels,
               *, reduction="sum", lamda=0.001, u=1.0, beta=0.001,
               lane_tile=None, return_bool_masks=False):
    """Pallas implementation of DArec_Loss.forward (reduction='sum' path)."""
    del lamda  # not used in the PyTorch forward either
    assert reduction == "sum"  # TODO(synk): 'mean' branch (divide by num observed) not implemented

    B, C = class_output.shape
    _, Ns = source_rating.shape
    _, Nt = target_rating.shape
    labels_2d = labels.astype(jnp.int32).reshape(B, 1)

    # ---- generation-aware tile sizing (v5e/v6e: 128 MiB VMEM, v7x: 64 MiB/TC) ----
    try:
        vmem_cap = int(pltpu.get_tpu_info().vmem_capacity_bytes)
        if vmem_cap <= 0:
            raise ValueError("bad vmem capacity")
    except Exception:
        vmem_cap = 64 << 20  # conservative floor (v7x per-TC)

    if lane_tile is None:
        # Per lane index, both sides, double-buffered: f32 pred + f32 rating + i8 mask.
        per_lane_bytes = 2 * 2 * B * (4 + 4 + 1)
        budget = int(vmem_cap * 0.4)
        lane_tile = max(128, (budget // max(per_lane_bytes, 1)) // 128 * 128)

    # ---- equalized block counts: both sides tiled into the same number of blocks ----
    Nmax = max(Ns, Nt)
    G = max(1, pl.cdiv(Nmax, lane_tile))

    def _side_tile(N, G):
        if G <= 1:
            return N                       # full-array lane block, single step
        t = _round_up(pl.cdiv(N, G), 128)  # lane-dense, 128-aligned
        return N if t >= N else t

    tns = _side_tile(Ns, G)
    tnt = _side_tile(Nt, G)
    blocks_src = pl.cdiv(Ns, tns)
    blocks_tgt = pl.cdiv(Nt, tnt)
    pad_src = blocks_src * tns - Ns
    pad_tgt = blocks_tgt * tnt - Nt
    equalized = (blocks_src == G) and (blocks_tgt == G)

    need_valid_src = (pad_src > 0) or (blocks_src < G)
    need_valid_tgt = (pad_tgt > 0) or (blocks_tgt < G)

    kernel = functools.partial(
        _darec_loss_kernel, beta=float(beta), u=float(u),
        tile_src=tns, tile_tgt=tnt, n_src=Ns, n_tgt=Nt,
        blocks_src=blocks_src, blocks_tgt=blocks_tgt,
        need_valid_src=need_valid_src, need_valid_tgt=need_valid_tgt)

    if blocks_src == G:
        _src_idx = lambda k: (0, k)
    else:  # rare fallback: clamp; duplicated steps are masked out in-kernel
        _src_idx = lambda k: (0, jnp.minimum(k, blocks_src - 1))
    if blocks_tgt == G:
        _tgt_idx = lambda k: (0, k)
    else:
        _tgt_idx = lambda k: (0, jnp.minimum(k, blocks_tgt - 1))

    in_specs = [
        pl.BlockSpec((B, tns), _src_idx),         # source_prediction
        pl.BlockSpec((B, tns), _src_idx),         # source_rating
        pl.BlockSpec((B, tnt), _tgt_idx),         # target_prediction
        pl.BlockSpec((B, tnt), _tgt_idx),         # target_rating
        pl.BlockSpec((B, C), lambda k: (0, 0)),   # class_output (tiny, re-fetched)
        pl.BlockSpec((B, 1), lambda k: (0, 0)),   # labels
    ]
    out_specs = (
        pl.BlockSpec((8, 128), lambda k: (k, 0)),  # per-tile partial losses
        pl.BlockSpec((B, tns), _src_idx),          # source mask (int8 0/1)
        pl.BlockSpec((B, tnt), _tgt_idx),          # target mask (int8 0/1)
    )
    out_shape = (
        jax.ShapeDtypeStruct((8 * G, 128), jnp.float32),
        jax.ShapeDtypeStruct((B, Ns), jnp.int8),
        jax.ShapeDtypeStruct((B, Nt), jnp.int8),
    )

    # VMEM budget: double-buffered f32 loads + int8 mask stores + partial block,
    # plus the small resident logits/labels; capped per-generation under physical VMEM.
    block_bytes = 2 * B * (tns + tnt) * 4 + B * (tns + tnt) + 8 * 128 * 4
    resident_bytes = B * C * 4 + B * 4
    working = 2 * block_bytes + 2 * resident_bytes
    vmem_limit = int(min(max(working + (4 << 20), 16 << 20), int(vmem_cap * 0.75)))

    # Equalized tiling -> every grid step writes distinct output blocks and the loss is
    # emitted as per-tile partials, so the lane axis is safely "parallel" (dual-TC on
    # v7x).  Fallback (clamped duplicates) must stay "arbitrary".
    semantics = ("parallel",) if equalized else ("arbitrary",)

    cost = pl.CostEstimate(
        flops=5 * B * (Ns + Nt) + 8 * B * C,
        transcendentals=B * C,
        bytes_accessed=9 * B * (Ns + Nt) + 4 * B * C + 4 * B + 8 * G * 128 * 4,
    )

    # TODO(synk): for very large B add a sublane (batch) grid axis tiled in multiples
    # of 32 so the int8 mask stores stay fully packed and per-block VMEM stays bounded.
    partials, src_mask_i8, tgt_mask_i8 = pl.pallas_call(
        kernel,
        grid=(G,),
        in_specs=in_specs,
        out_specs=out_specs,
        out_shape=out_shape,
        compiler_params=pltpu.CompilerParams(
            dimension_semantics=semantics,
            vmem_limit_bytes=vmem_limit),
        cost_estimate=cost,
    )(source_prediction, source_rating,
      target_prediction, target_rating,
      class_output, labels_2d)

    # Tiny final reduction over the (8*G, 128) partials (only one entry per tile
    # is nonzero); matches PyTorch's (1,)-shaped scalar loss.
    loss = jnp.sum(partials, dtype=jnp.float32).reshape((1,))

    if return_bool_masks:
        # Optional extra elementwise pass for callers that need exact torch.bool dtype.
        return loss, src_mask_i8 != 0, tgt_mask_i8 != 0
    return loss, src_mask_i8, tgt_mask_i8


if __name__ == "__main__":
    def make_inputs(key, B, Ns, Nt, C):
        k1, k2, k3, k4, k5, k6, k7 = jax.random.split(key, 7)
        source_prediction = jax.random.normal(k1, (B, Ns), dtype=jnp.float32)
        target_prediction = jax.random.normal(k2, (B, Nt), dtype=jnp.float32)
        src_full = jax.random.uniform(k3, (B, Ns), minval=1.0, maxval=5.0)
        tgt_full = jax.random.uniform(k4, (B, Nt), minval=1.0, maxval=5.0)
        src_obs = jax.random.bernoulli(k5, 0.5, (B, Ns))
        tgt_obs = jax.random.bernoulli(k6, 0.5, (B, Nt))
        source_rating = jnp.where(src_obs, src_full, 0.0).astype(jnp.float32)
        target_rating = jnp.where(tgt_obs, tgt_full, 0.0).astype(jnp.float32)
        class_output = jax.random.normal(k7, (B, C), dtype=jnp.float32)
        labels = (jnp.arange(B) % C).astype(jnp.int32)
        return (class_output, source_prediction, target_prediction,
                source_rating, target_rating, labels)

    def ref(class_output, sp, tp, sr, tr, labels, *, u=1.0, beta=0.001):
        sm = sr != 0.0
        tm = tr != 0.0
        sl = jnp.sum((sp * sm - sr) ** 2)
        tl = jnp.sum((tp * tm - tr) ** 2)
        B = class_output.shape[0]
        logz = jax.nn.logsumexp(class_output, axis=-1)
        ce = jnp.mean(logz - class_output[jnp.arange(B), labels])
        return sl + beta * tl + u * ce, sm, tm

    def check(args, **kw):
        loss, sm, tm = darec_loss(*args, **kw)
        jax.block_until_ready((loss, sm, tm))
        r_loss, r_sm, r_tm = ref(*args)
        assert jnp.allclose(loss[0], r_loss, rtol=1e-4, atol=1e-5), (loss, r_loss)
        assert bool(jnp.all((sm != 0) == r_sm)) and bool(jnp.all((tm != 0) == r_tm))

    key = jax.random.PRNGKey(0)
    k_small, k_big, k_skew = jax.random.split(key, 3)

    # 1) Small single-step case (auto lane tile -> whole arrays in one block).
    check(make_inputs(k_small, B=8, Ns=32, Nt=48, C=2),
          reduction="sum", lamda=0.001, u=1.0, beta=0.001)

    # 2) Multi-tile, equalized block counts + ragged source tail ("parallel" path).
    check(make_inputs(k_big, B=8, Ns=640, Nt=384, C=2), lane_tile=256)

    # 3) Skewed sizes forcing the clamped/"arbitrary" fallback path (+ bool masks).
    check(make_inputs(k_skew, B=8, Ns=1024, Nt=128, C=2), lane_tile=128,
          return_bool_masks=True)

    print("KERNEL_OK")
</pallas_src>

<mosaic_0001>
module attributes {stable_mosaic.version = 11 : i64} {
  func.func @_darec_loss_kernel(%arg0: i32, %arg1: memref<8x32xf32, #tpu.memory_space<vmem>>, %arg2: memref<8x32xf32, #tpu.memory_space<vmem>>, %arg3: memref<8x48xf32, #tpu.memory_space<vmem>>, %arg4: memref<8x48xf32, #tpu.memory_space<vmem>>, %arg5: memref<8x2xf32, #tpu.memory_space<vmem>>, %arg6: memref<8x1xi32, #tpu.memory_space<vmem>>, %arg7: memref<8x128xf32, #tpu.memory_space<vmem>>, %arg8: memref<8x32xi8, #tpu.memory_space<vmem>>, %arg9: memref<8x48xi8, #tpu.memory_space<vmem>>) attributes {dimension_semantics = [#tpu.dimension_semantics<parallel>], iteration_bounds = array<i64: 1>, scalar_prefetch = 0 : i64, scratch_operands = 0 : i64, tpu.core_type = #tpu.core_type<tc>, window_params = [{transform_indices = @transform_0, window_bounds = array<i64: 8, 32>}, {transform_indices = @transform_1, window_bounds = array<i64: 8, 32>}, {transform_indices = @transform_2, window_bounds = array<i64: 8, 48>}, {transform_indices = @transform_3, window_bounds = array<i64: 8, 48>}, {pipeline_mode = #tpu.pipeline_mode<synchronous>, transform_indices = @transform_4, window_bounds = array<i64: 8, 2>}, {pipeline_mode = #tpu.pipeline_mode<synchronous>, transform_indices = @transform_5, window_bounds = array<i64: 8, 1>}, {transform_indices = @transform_6, window_bounds = array<i64: 8, 128>}, {transform_indices = @transform_7, window_bounds = array<i64: 8, 32>}, {transform_indices = @transform_8, window_bounds = array<i64: 8, 48>}]} {
    %c0 = arith.constant 0 : index
    %c0_0 = arith.constant 0 : index
    %0 = vector.load %arg2[%c0, %c0_0] : memref<8x32xf32, #tpu.memory_space<vmem>>, vector<8x32xf32>
    %c0_1 = arith.constant 0 : index
    %c0_2 = arith.constant 0 : index
    %1 = vector.load %arg1[%c0_1, %c0_2] : memref<8x32xf32, #tpu.memory_space<vmem>>, vector<8x32xf32>
    %cst = arith.constant 0.000000e+00 : f32
    %2 = vector.broadcast %cst : f32 to vector<8x32xf32>
    %3 = arith.cmpf one, %0, %2 : vector<8x32xf32>
    %4 = arith.extui %3 : vector<8x32xi1> to vector<8x32xi8>
    %c0_3 = arith.constant 0 : index
    %c0_4 = arith.constant 0 : index
    %5 = vector.load %arg8[%c0_3, %c0_4] : memref<8x32xi8, #tpu.memory_space<vmem>>, vector<8x32xi8>
    tpu.vector_store %arg8[%c0_3, %c0_4], %4 {strides = array<i32>} : memref<8x32xi8, #tpu.memory_space<vmem>>, vector<8x32xi8>,
    %cst_5 = arith.constant 0.000000e+00 : f32
    %6 = vector.broadcast %cst_5 : f32 to vector<8x32xf32>
    %7 = arith.select %3, %1, %6 : vector<8x32xi1>, vector<8x32xf32>
    %8 = arith.subf %7, %0 : vector<8x32xf32>
    %9 = arith.mulf %8, %8 : vector<8x32xf32>
    %10 = vector.shape_cast %9 : vector<8x32xf32> to vector<1x8x32xf32>
    %cst_6 = arith.constant dense<0.000000e+00> : vector<1xf32>
    %11 = vector.multi_reduction <add>, %10, %cst_6 [1, 2] : vector<1x8x32xf32> to vector<1xf32>
    %12 = vector.shape_cast %11 : vector<1xf32> to vector<1x1x1xf32>
    %13 = vector.extract %12[0, 0, 0] : f32 from vector<1x1x1xf32>
    %c0_7 = arith.constant 0 : index
    %c0_8 = arith.constant 0 : index
    %14 = vector.load %arg4[%c0_7, %c0_8] : memref<8x48xf32, #tpu.memory_space<vmem>>, vector<8x48xf32>
    %c0_9 = arith.constant 0 : index
    %c0_10 = arith.constant 0 : index
    %15 = vector.load %arg3[%c0_9, %c0_10] : memref<8x48xf32, #tpu.memory_space<vmem>>, vector<8x48xf32>
    %cst_11 = arith.constant 0.000000e+00 : f32
    %16 = vector.broadcast %cst_11 : f32 to vector<8x48xf32>
    %17 = arith.cmpf one, %14, %16 : vector<8x48xf32>
    %18 = arith.extui %17 : vector<8x48xi1> to vector<8x48xi8>
    %c0_12 = arith.constant 0 : index
    %c0_13 = arith.constant 0 : index
    %19 = vector.load %arg9[%c0_12, %c0_13] : memref<8x48xi8, #tpu.memory_space<vmem>>, vector<8x48xi8>
    tpu.vector_store %arg9[%c0_12, %c0_13], %18 {strides = array<i32>} : memref<8x48xi8, #tpu.memory_space<vmem>>, vector<8x48xi8>,
    %cst_14 = arith.constant 0.000000e+00 : f32
    %20 = vector.broadcast %cst_14 : f32 to vector<8x48xf32>
    %21 = arith.select %17, %15, %20 : vector<8x48xi1>, vector<8x48xf32>
    %22 = arith.subf %21, %14 : vector<8x48xf32>
    %23 = arith.mulf %22, %22 : vector<8x48xf32>
    %24 = vector.shape_cast %23 : vector<8x48xf32> to vector<1x8x48xf32>
    %cst_15 = arith.constant dense<0.000000e+00> : vector<1xf32>
    %25 = vector.multi_reduction <add>, %24, %cst_15 [1, 2] : vector<1x8x48xf32> to vector<1xf32>
    %26 = vector.shape_cast %25 : vector<1xf32> to vector<1x1x1xf32>
    %27 = vector.extract %26[0, 0, 0] : f32 from vector<1x1x1xf32>
    %cst_16 = arith.constant 1.000000e-03 : f32
    %28 = arith.mulf %cst_16, %27 : f32
    %29 = arith.addf %13, %28 : f32
    %c0_i32 = arith.constant 0 : i32
    %30 = arith.cmpi eq, %arg0, %c0_i32 : i32
    %31 = arith.extui %30 : i1 to i32
    %c0_i32_17 = arith.constant 0 : i32
    %32 = arith.cmpi ne, %31, %c0_i32_17 : i32
    %33 = scf.if %32 -> (f32) {
      %c0_23 = arith.constant 0 : index
      %c0_24 = arith.constant 0 : index
      %46 = vector.load %arg5[%c0_23, %c0_24] : memref<8x2xf32, #tpu.memory_space<vmem>>, vector<8x2xf32>
      %c0_25 = arith.constant 0 : index
      %c0_26 = arith.constant 0 : index
      %47 = vector.load %arg6[%c0_25, %c0_26] : memref<8x1xi32, #tpu.memory_space<vmem>>, vector<8x1xi32>
      %cst_27 = arith.constant dense<0xFF800000> : vector<8xf32>
      %48 = vector.multi_reduction <maximumf>, %46, %cst_27 [1] : vector<8x2xf32> to vector<8xf32>
      %49 = vector.shape_cast %48 : vector<8xf32> to vector<8x1xf32>
      %50 = vector.broadcast %49 : vector<8x1xf32> to vector<8x2xf32>
      %51 = arith.subf %46, %50 : vector<8x2xf32>
      %52 = math.exp %51 : vector<8x2xf32>
      %cst_28 = arith.constant dense<0.000000e+00> : vector<8xf32>
      %53 = vector.multi_reduction <add>, %52, %cst_28 [1] : vector<8x2xf32> to vector<8xf32>
      %54 = vector.shape_cast %53 : vector<8xf32> to vector<8x1xf32>
      %55 = math.log %54 : vector<8x1xf32>
      %56 = arith.addf %55, %49 : vector<8x1xf32>
      %57 = tpu.iota {dimensions = array<i32: 1>} : vector<8x2xi32>
      %58 = vector.broadcast %47 : vector<8x1xi32> to vector<8x2xi32>
      %59 = arith.cmpi eq, %57, %58 : vector<8x2xi32>
      %cst_29 = arith.constant 0.000000e+00 : f32
      %60 = vector.broadcast %cst_29 : f32 to vector<8x2xf32>
      %61 = arith.select %59, %46, %60 : vector<8x2xi1>, vector<8x2xf32>
      %cst_30 = arith.constant dense<0.000000e+00> : vector<8xf32>
      %62 = vector.multi_reduction <add>, %61, %cst_30 [1] : vector<8x2xf32> to vector<8xf32>
      %63 = vector.shape_cast %62 : vector<8xf32> to vector<8x1xf32>
      %64 = arith.subf %56, %63 : vector<8x1xf32>
      %65 = vector.shape_cast %64 : vector<8x1xf32> to vector<1x8x1xf32>
      %cst_31 = arith.constant dense<0.000000e+00> : vector<1xf32>
      %66 = vector.multi_reduction <add>, %65, %cst_31 [1, 2] : vector<1x8x1xf32> to vector<1xf32>
      %67 = vector.shape_cast %66 : vector<1xf32> to vector<1x1x1xf32>
      %68 = vector.extract %67[0, 0, 0] : f32 from vector<1x1x1xf32>
      %cst_32 = arith.constant 1.250000e-01 : f32
      %69 = arith.mulf %68, %cst_32 : f32
      scf.yield %69 : f32
    } else {
      %cst_23 = arith.constant 0.000000e+00 : f32
      scf.yield %cst_23 : f32
    }
    %34 = arith.addf %29, %33 : f32
    %35 = tpu.iota {dimensions = array<i32: 0>} : vector<8x128xi32>
    %36 = tpu.iota {dimensions = array<i32: 1>} : vector<8x128xi32>
    %c0_i32_18 = arith.constant 0 : i32
    %37 = vector.broadcast %c0_i32_18 : i32 to vector<8x128xi32>
    %38 = arith.cmpi eq, %35, %37 : vector<8x128xi32>
    %c0_i32_19 = arith.constant 0 : i32
    %39 = vector.broadcast %c0_i32_19 : i32 to vector<8x128xi32>
    %40 = arith.cmpi eq, %36, %39 : vector<8x128xi32>
    %41 = arith.andi %38, %40 : vector<8x128xi1>
    %cst_20 = arith.constant 0.000000e+00 : f32
    %42 = vector.broadcast %34 : f32 to vector<8x128xf32>
    %43 = vector.broadcast %cst_20 : f32 to vector<8x128xf32>
    %44 = arith.select %41, %42, %43 : vector<8x128xi1>, vector<8x128xf32>
    %c0_21 = arith.constant 0 : index
    %c0_22 = arith.constant 0 : index
    %45 = vector.load %arg7[%c0_21, %c0_22] : memref<8x128xf32, #tpu.memory_space<vmem>>, vector<8x128xf32>
    tpu.vector_store %arg7[%c0_21, %c0_22], %44 {strides = array<i32>} : memref<8x128xf32, #tpu.memory_space<vmem>>, vector<8x128xf32>,
    return
  }
  func.func @transform_0(%arg0: i32) -> (i32, i32) {
    %c0_i32 = arith.constant 0 : i32
    %c0_i32_0 = arith.constant 0 : i32
    return %c0_i32, %arg0 : i32, i32
  }
  func.func @transform_1(%arg0: i32) -> (i32, i32) {
    %c0_i32 = arith.constant 0 : i32
    %c0_i32_0 = arith.constant 0 : i32
    return %c0_i32, %arg0 : i32, i32
  }
  func.func @transform_2(%arg0: i32) -> (i32, i32) {
    %c0_i32 = arith.constant 0 : i32
    %c0_i32_0 = arith.constant 0 : i32
    return %c0_i32, %arg0 : i32, i32
  }
  func.func @transform_3(%arg0: i32) -> (i32, i32) {
    %c0_i32 = arith.constant 0 : i32
    %c0_i32_0 = arith.constant 0 : i32
    return %c0_i32, %arg0 : i32, i32
  }
  func.func @transform_4(%arg0: i32) -> (i32, i32) {
    %c0_i32 = arith.constant 0 : i32
    %c0_i32_0 = arith.constant 0 : i32
    %c0_i32_1 = arith.constant 0 : i32
    return %c0_i32, %c0_i32_0 : i32, i32
  }
  func.func @transform_5(%arg0: i32) -> (i32, i32) {
    %c0_i32 = arith.constant 0 : i32
    %c0_i32_0 = arith.constant 0 : i32
    %c0_i32_1 = arith.constant 0 : i32
    return %c0_i32, %c0_i32_0 : i32, i32
  }
  func.func @transform_6(%arg0: i32) -> (i32, i32) {
    %c0_i32 = arith.constant 0 : i32
    %c0_i32_0 = arith.constant 0 : i32
    return %arg0, %c0_i32 : i32, i32
  }
  func.func @transform_7(%arg0: i32) -> (i32, i32) {
    %c0_i32 = arith.constant 0 : i32
    %c0_i32_0 = arith.constant 0 : i32
    return %c0_i32, %arg0 : i32, i32
  }
  func.func @transform_8(%arg0: i32) -> (i32, i32) {
    %c0_i32 = arith.constant 0 : i32
    %c0_i32_0 = arith.constant 0 : i32
    return %c0_i32, %arg0 : i32, i32
  }
}

</mosaic_0001>

<bundles_post_ra>
// kernel: tpu_custom_call.1
= control target key start
LH: loop header
LB: loop body
LE: loop exit
PB: predicated region body
PF: predicated region fallthrough
CT: control target
= control target key end

     0   :  { %14 = vsyncpa [#allocation3], 0  ;;  %s429_s0 = inlined_call_operand.vmem [shape: f32[8,32], index: 0, kind: input, shape index: {}]   ;;  %s430_s1 = inlined_call_operand.vmem [shape: f32[8,32], index: 1, kind: input, shape index: {}]   ;;  %s431_s2 = inlined_call_operand.vmem [shape: f32[8,48], index: 2, kind: input, shape index: {}]   ;;  %s432_s3 = inlined_call_operand.hbm [shape: f32[8,48], index: 3, kind: input, shape index: {}]   ;;  %s433_s4 = inlined_call_operand.vmem [shape: f32[8,2], index: 4, kind: input, shape index: {}]   ;;  %s434_s5 = inlined_call_operand.vmem [shape: s32[8,1], index: 5, kind: input, shape index: {}]   ;;  %s435_s6 = inlined_call_operand.hbm [shape: f32[8,128], index: 6, kind: output, shape index: {0}]   ;;  %s436_s7 = inlined_call_operand.hbm [shape: s8[8,32], index: 7, kind: output, shape index: {1}]   ;;  %s437_s8 = inlined_call_operand.hbm [shape: s8[8,48], index: 8, kind: output, shape index: {2}]  }
   0x1   :  { %15 = vsyncpa [#allocation4], 0 }
   0x2   :  { %16 = vsyncpa [#allocation7], 0  ;;  %s298_s27 = smov [#allocation2]   ;;  %s204_s9 = scalar_lea.hbm %s432_s3, 128 }
   0x3   :  { %s29_s28 = sshll.u32 %s298_s27, 4  ;;  %p205_p0 = scmp.ne.s32.totalorder %s432_s3, %s204_s9  ;;  %s30_s28 = int_to_ptr.vmem [resolvable:$true] %s29_s28 }
   0x4   :  { %p208_p1 = scmp.lt.u32.totalorder %s204_s9, %s432_s3 }
   0x6   :  { %p210_p2 = pnand %p208_p1, %p205_p0 }
   0x8   :  { %213 = shalt.err (!%p210_p2)
}
   0x9   :  { %s214_s14 = scalar_lea.vmem %s30_s28, 128  ;;  %p219_p4 = scmp.lt.s32.totalorder %s30_s28, %s30_s28 }
   0xa   :  { %p215_p3 = scmp.ne.s32.totalorder %s30_s28, %s214_s14  ;;  %p220_p5 = scmp.lt.s32.totalorder %s214_s14, %s214_s14 }
   0xc   :  { %p221_p6 = por %p220_p5, %p219_p4 }
   0xe   :  { %p222_p7 = pnand %p221_p6, %p215_p3 }
  0x10   :  { %225 = shalt.err (!%p222_p7)
}
  0x11   :  { %32 = dma.hbm_to_vmem [thread:$0]  %s432_s3, 128, %s30_s28, [#allocation3]  }
  0x12   :  { %292 = dma.done.wait [#allocation3], 128  }
  0x13   :  { %293 = vsyncadd [#allocation3], 4294967168  ;;  %v299_v0 = vmov 0   ;;  %vm94_vm0 = vcmask 15360   ;;  %v92_v1 = vld [vmem:[%s433_s4] sm:$0xff]  ;;  %v107_v7 = vlaneseq  ;;  %vm53_vm3 = vcmask 261120  }
  0x14   :  { %199 = vset.pattern.permute.xlu0 %v299_v0  ;;  %v95_v2 = vsel %vm94_vm0, %v92_v1, -inf  ;;  %v93_v3 = vld [vmem:[%s434_s5] sm:$0xff]  ;;  %vm75_vm5 = vcmask 392192   ;;  %vm118_vm6 = vcmask 7168   ;;  %vm48_vm11 = vcmask 254976  }
  0x15   :  { %96 = vmax.xlane.f32.xlu0 %v95_v2  ;;  %v42_v8 = vld [vmem:[%s430_s1] sm:$0xff]  ;;  %v372_v9 = vand.u32 127, %v107_v7  ;;  %vm70_vm12 = vcmask 386048  }
  0x16   :  { %v43_v10 = vld [vmem:[%s429_s0] sm:$0xff]  ;;  %vm44_vm1 = vcmp.ne.f32.partialorder %v42_v8, 0.0 }
  0x17   :  { %v50_v12 = vsel %vm44_vm1, %v43_v10, 0.0  ;;  %v64_v19 = vld [vmem:[#allocation2] sm:$0xff]  ;;  %vm45_vm9 = vmpackc.low %vm44_vm1, %vm44_vm1 }
  0x18   :  { %v51_v13 = vsub.f32 %v50_v12, %v42_v8  ;;  %vm66_vm4 = vcmp.ne.f32.partialorder %v64_v19, 0.0  ;;  %v65_v21 = vld [vmem:[%s431_s2] sm:$0xff]  ;;  %vm46_vm10 = vmpackc.even %vm45_vm9, %vm45_vm9  ;;  %s300_s2 = smov [#allocation6]  }
  0x19   :  { %v72_v22 = vsel %vm66_vm4, %v65_v21, 0.0  ;;  %vm67_vm7 = vmpackc.low %vm66_vm4, %vm66_vm4  ;;  %v47_v48 = vsel %vm46_vm10, 16843009, %v299_v0  ;;  %s162_s5 = sshll.u32 %s300_s2, 4  ;;  %s163_s5 = int_to_ptr.vmem [resolvable:$true] %s162_s5 }
  0x1a   :  { %v52_v18 = vmul.f32 %v51_v13, %v51_v13  ;;  %v73_v23 = vsub.f32 %v72_v22, %v64_v19  ;;  %vm68_vm8 = vmpackc.even %vm67_vm7, %vm67_vm7  ;;  %49 = vst.msk [vmem:[#allocation6] sm:$0x3] %vm48_vm11, %v47_v48  ;;  %s226_s23 = scalar_lea.vmem %s163_s5, 32  ;;  %p231_p9 = scmp.lt.s32.totalorder %s163_s5, %s163_s5 }
  0x1b   :  { %v69_v47 = vsel %vm68_vm8, 16843009, %v299_v0  ;;  %p227_p8 = scmp.ne.s32.totalorder %s163_s5, %s226_s23  ;;  %p232_p10 = scmp.lt.s32.totalorder %s226_s23, %s226_s23 }
  0x1c   :  { %v54_v20 = vsel %vm53_vm3, %v52_v18, 0.0  ;;  %v74_v24 = vmul.f32 %v73_v23, %v73_v23 }
  0x1d   :  { %p233_p11 = por %p232_p10, %p231_p9 }
  0x1e   :  { %v76_v25 = vsel %vm75_vm5, %v74_v24, 0.0 }
  0x1f   :  { %p234_p12 = pnand %p233_p11, %p227_p8 }
  0x2b   :  { %110 = vperm.xlu0 %199, %v93_v3  }
  0xa2   :  { %v97_v4 = vpop.xlane.xlu0 %96 }
  0xa3   :  { %v98_v5 = vsub.f32 %v92_v1, %v97_v4 }
  0xa5   :  { %v99_v6 = vmul.f32 1.442695, %v98_v5 }
  0xa7   :  { %200 = vpow2.f32 %v99_v6 }
  0xaa   :  { %v111_v11 = vpop.permute.xlu0 %110 }
  0xab   :  { %vm112_vm2 = vcmp.eq.s32.totalorder %v372_v9, %v111_v11 }
  0xac   :  { %v113_v15 = vsel %vm112_vm2, %v92_v1, 0.0 }
  0xad   :  { %v114_v17 = vsel %vm94_vm0, %v113_v15, 0.0 }
  0xb1   :  { %v201_v14 = vpop.eup %200 }
  0xb2   :  { %v101_v16 = vsel %vm94_vm0, %v201_v14, 0.0 }
  0xb3   :  { %102 = vadd.xlane.f32.xlu1 %v101_v16 }
  0xb7   :  { %115 = vadd.xlane.f32.xlu1 %v114_v17 }
  0xbb   :  { %55 = vadd.xlane.f32.xlu1 %v54_v20 }
  0xbf   :  { %77 = vadd.xlane.f32.xlu1 %v76_v25 }
 0x140   :  { %v103_v26 = vpop.xlane.xlu1 %102 }
 0x141   :  { %202 = vlog2.f32 %v103_v26 }
 0x144   :  { %v116_v27 = vpop.xlane.xlu1 %115 }
 0x148   :  { %v56_v28 = vpop.xlane.xlu1 %55 }
 0x149   :  { %v57_v29 = vrot.slane %v56_v28, 4 }
 0x14b   :  { %v203_v30 = vpop.eup %202  ;;  %v58_v31 = vadd.f32 %v57_v29, %v56_v28 }
 0x14c   :  { %v105_v32 = vmul.f32 0.6931472, %v203_v30  ;;  %v78_v37 = vpop.xlane.xlu1 %77 }
 0x14d   :  { %v59_v33 = vrot.slane %v58_v31, 2  ;;  %v79_v38 = vrot.slane %v78_v37, 4 }
 0x14e   :  { %v106_v34 = vadd.f32 %v105_v32, %v97_v4 }
 0x14f   :  { %v60_v35 = vadd.f32 %v59_v33, %v58_v31  ;;  %v80_v41 = vadd.f32 %v79_v38, %v78_v37 }
 0x150   :  { %v117_v36 = vsub.f32 %v106_v34, %v116_v27 }
 0x151   :  { %v61_v39 = vrot.slane %v60_v35, 1  ;;  %v81_v43 = vrot.slane %v80_v41, 2 }
 0x152   :  { %v119_v40 = vsel %vm118_vm6, %v117_v36, 0.0 }
 0x153   :  { %120 = vadd.xlane.f32.xlu1 %v119_v40  ;;  %v62_v42 = vadd.f32 %v61_v39, %v60_v35  ;;  %v82_v44 = vadd.f32 %v81_v43, %v80_v41 }
 0x155   :  { %188 = vpush %v62_v42  ;;  %v83_v45 = vrot.slane %v82_v44, 1 }
 0x157   :  { %v84_v46 = vadd.f32 %v83_v45, %v82_v44 }
 0x159   :  { %190 = vpush %v84_v46 }
 0x15a   :  { %237 = shalt.err (!%p234_p12)
}
 0x15b   :  { %s238_s26 = scalar_lea.hbm %s436_s7, 32 }
 0x15c   :  { %p239_p13 = scmp.ne.s32.totalorder %s436_s7, %s238_s26  ;;  %p242_p0 = scmp.lt.u32.totalorder %s238_s26, %s436_s7 }
 0x15e   :  { %p244_p1 = pnand %p242_p0, %p239_p13 }
 0x160   :  { %247 = shalt.err (!%p244_p1)
}
 0x161   :  { %165 = dma.vmem_to_hbm [thread:$0]  %s163_s5, 32, %s436_s7, [#allocation7]   ;;  %71 = vst.msk [vmem:[#allocation8] sm:$0x3] %vm70_vm12, %v69_v47 }
 0x162   :  { %s301_s11 = smov [#allocation8]  }
 0x163   :  { %s172_s12 = sshll.u32 %s301_s11, 4  ;;  %s173_s12 = int_to_ptr.vmem [resolvable:$true] %s172_s12 }
 0x164   :  { %s248_s13 = scalar_lea.vmem %s173_s12, 32  ;;  %p253_p3 = scmp.lt.s32.totalorder %s173_s12, %s173_s12 }
 0x165   :  { %p249_p2 = scmp.ne.s32.totalorder %s173_s12, %s248_s13  ;;  %p254_p4 = scmp.lt.s32.totalorder %s248_s13, %s248_s13 }
 0x167   :  { %p255_p5 = por %p254_p4, %p253_p3 }
 0x169   :  { %p256_p6 = pnand %p255_p5, %p249_p2 }
 0x16b   :  { %259 = shalt.err (!%p256_p6)
}
 0x16c   :  { %s260_s16 = scalar_lea.hbm %s437_s8, 32 }
 0x16d   :  { %p261_p7 = scmp.ne.s32.totalorder %s437_s8, %s260_s16  ;;  %p264_p8 = scmp.lt.u32.totalorder %s260_s16, %s437_s8 }
 0x16f   :  { %p266_p9 = pnand %p264_p8, %p261_p7 }
 0x171   :  { %269 = shalt.err (!%p266_p9)
}
 0x172   :  { %175 = dma.vmem_to_hbm [thread:$0]  %s173_s12, 32, %s437_s8, [#allocation7]   ;;  %v137_v56 = vshrl.u32 %v107_v7, 7  ;;  %vm141_vm13 = vcmp.eq.s32.totalorder %v372_v9, 0 }
 0x173   :  { %s302_s8 = smov [#allocation5]  }
 0x174   :  { %vm140_vm14 = vcmp.eq.s32.totalorder %v137_v56, 0  ;;  %s152_s5 = sshll.u32 %s302_s8, 4  ;;  %s153_s5 = int_to_ptr.vmem [resolvable:$true] %s152_s5 }
 0x175   :  { %vm142_vm15 = vmand %vm140_vm14, %vm141_vm13  ;;  %s270_s24 = scalar_lea.vmem %s153_s5, 128  ;;  %p275_p11 = scmp.lt.s32.totalorder %s153_s5, %s153_s5 }
 0x176   :  { %p271_p10 = scmp.ne.s32.totalorder %s153_s5, %s270_s24  ;;  %p276_p12 = scmp.lt.s32.totalorder %s270_s24, %s270_s24 }
 0x178   :  { %p277_p13 = por %p276_p12, %p275_p11 }
 0x17a   :  { %p278_p0 = pnand %p277_p13, %p271_p10 }
 0x186   :  { %s189_s21 = spop %188 }
 0x18a   :  { %s191_s4 = spop %190 }
 0x18b   :  { %s86_s22 = smul.f32 0.001, %s191_s4 }
 0x18d   :  { %s87_s1 = sadd.f32 %s189_s21, %s86_s22 }
 0x1e0   :  { %v121_v49 = vpop.xlane.xlu1 %120 }
 0x1e1   :  { %v122_v50 = vrot.slane %v121_v49, 4 }
 0x1e3   :  { %v123_v51 = vadd.f32 %v122_v50, %v121_v49 }
 0x1e5   :  { %v124_v52 = vrot.slane %v123_v51, 2 }
 0x1e7   :  { %v125_v53 = vadd.f32 %v124_v52, %v123_v51 }
 0x1e9   :  { %v126_v54 = vrot.slane %v125_v53, 1 }
 0x1eb   :  { %v127_v55 = vadd.f32 %v126_v54, %v125_v53 }
 0x1ed   :  { %192 = vpush %v127_v55 }
 0x21e   :  { %s193_s0 = spop %192 }
 0x21f   :  { %s129_s2 = smul.f32 0.125, %s193_s0 }
 0x221   :  { %s135_s23 = sadd.f32 %s129_s2, %s87_s1 }
 0x223   :  { %v143_v57 = vstv %s135_s23 }
 0x224   :  { %v144_v58 = vsel %vm142_vm15, %v143_v57, 0.0 }
 0x225   :  { %145 = vst [vmem:[#allocation5] sm:$0xff] %v144_v58 }
 0x226   :  { %281 = shalt.err (!%p278_p0)
}
 0x227   :  { %s282_s27 = scalar_lea.hbm %s435_s6, 128 }
 0x228   :  { %p283_p1 = scmp.ne.s32.totalorder %s435_s6, %s282_s27  ;;  %p286_p2 = scmp.lt.u32.totalorder %s282_s27, %s435_s6 }
 0x22a   :  { %p288_p3 = pnand %p286_p2, %p283_p1 }
 0x22c   :  { %291 = shalt.err (!%p288_p3)
}
 0x22d   :  { %155 = dma.vmem_to_hbm [thread:$0]  %s153_s5, 128, %s435_s6, [#allocation4]  }
 0x22e   :  { %294 = dma.done.wait [#allocation4], 128  }
 0x22f   :  { %295 = vsyncadd [#allocation4], 4294967168 }
 0x230   :  { %296 = dma.done.wait [#allocation7], 64  }
 0x231   :  { %297 = vsyncadd [#allocation7], 4294967232 }
 0x232   :  { %185 = vsyncpa [#allocation3], 1 }
 0x233   :  { %186 = vsyncpa [#allocation4], 1 }
 0x234   :  { %187 = vsyncpa [#allocation7], 1 }

</bundles_post_ra>
